<compile_context>
chip_gen: v5e
topology: v5e:2x2
jax: 0.10.0
libtpu: 0.0.40
codegen_flags: <defaults>
</compile_context>

<pallas_src>
import functools
import math
from typing import NamedTuple

import jax
import jax.numpy as jnp
from jax.experimental import pallas as pl
from jax.experimental.pallas import tpu as pltpu


def _round_up(x, m):
    return (x + m - 1) // m * m


@functools.lru_cache(maxsize=1)
def _vmem_capacity_bytes():
    """Best-effort VMEM capacity query; conservative (v7x) fallback."""
    try:
        info = pltpu.get_tpu_info()
        for name in ("vmem_capacity_bytes", "vmem_bytes", "vmem_size_bytes"):
            cap = getattr(info, name, None)
            if cap:
                return int(cap)
    except Exception:
        pass
    return 64 * 1024 * 1024


# ----------------------------------------------------------------------------------------------
# Kernels
# ----------------------------------------------------------------------------------------------

def _layernorm_epilogue(y, consts_ref, o_ref, *, inv_d, eps):
    """LN(y) with padded feature lanes of y guaranteed to be exactly 0 (fused-moment pass)."""
    b2 = consts_ref[0:1, :]
    gamma = consts_ref[1:2, :]
    beta = consts_ref[2:3, :]
    y = y + b2                                                    # padded lanes stay 0
    s1 = jnp.sum(y, axis=-1, keepdims=True)
    s2 = jnp.sum(y * y, axis=-1, keepdims=True)
    mean = s1 * inv_d
    var = s2 * inv_d - mean * mean                                # biased variance (torch LN)
    y_hat = (y - mean) * jax.lax.rsqrt(var + eps)
    o_ref[...] = (y_hat * gamma + beta).astype(o_ref.dtype)


def _ffn_ln_resident_kernel(x_ref, w1_ref, b1_ref, w2_ref, consts_ref, o_ref,
                            *, inv_d, eps):
    """Weight-resident path: one row tile per grid step, full hidden dim in one pass."""
    x = x_ref[...]                                                # (tm, d_model_p)
    h = jnp.dot(x, w1_ref[...], preferred_element_type=jnp.float32)
    h = jnp.maximum(h + b1_ref[...], 0.0)                         # (tm, d_inner_p), f32
    y = jnp.dot(h.astype(w2_ref.dtype), w2_ref[...],
                preferred_element_type=jnp.float32)
    y = y + x.astype(jnp.float32)                                 # dropout == identity; residual
    _layernorm_epilogue(y, consts_ref, o_ref, inv_d=inv_d, eps=eps)


def _ffn_ln_stream_kernel(x_ref, w1_ref, b1_ref, w2_ref, consts_ref, o_ref, acc_ref,
                          *, tk, inv_d, eps):
    """Streaming path: hidden axis is an 'arbitrary' grid axis with an f32 VMEM accumulator."""
    k = pl.program_id(1)

    @pl.when(k == 0)
    def _():
        acc_ref[...] = jnp.zeros_like(acc_ref)

    x = x_ref[...]                                                # (tm, d_model_p), resident over k

    off = pl.multiple_of(k * tk, 128)
    b1 = b1_ref[:, pl.ds(off, tk)]                                # resident b1, sliced in-kernel

    h = jnp.dot(x, w1_ref[...], preferred_element_type=jnp.float32)
    h = jnp.maximum(h + b1, 0.0)                                  # per-chunk ReLU is exact
    acc_ref[...] += jnp.dot(h.astype(w2_ref.dtype), w2_ref[...],
                            preferred_element_type=jnp.float32)

    @pl.when(k == pl.num_programs(1) - 1)
    def _():
        y = acc_ref[...] + x.astype(jnp.float32)                  # residual
        _layernorm_epilogue(y, consts_ref, o_ref, inv_d=inv_d, eps=eps)


# ----------------------------------------------------------------------------------------------
# Tile planner
# ----------------------------------------------------------------------------------------------

def _choose_tiles(rows, d_model_p, d_inner_p, cdt_size, out_size, vmem_cap, tm_max, mode):
    rows8 = _round_up(rows, 8)
    budget = int(vmem_cap * 0.70)                                 # leave headroom for the compiler
    small = (3 * d_model_p + 2 * d_inner_p) * 4                   # consts + b1 (generous)

    # Keep >=2 row tiles whenever rows allow (megacore / 2 TensorCores on v7x).
    tm_two = rows8 if rows8 < 16 else max(8, (rows8 // 2) // 8 * 8)
    tm_cap = max(8, min(tm_max, tm_two))

    def fit_tm(avail, per_row):
        if avail <= 0:
            return 0
        return min(tm_cap, (avail // per_row) // 8 * 8)

    # --- full weight residency: W1/W2 DMA'd exactly once for the whole kernel ---
    if mode in ("auto", "resident"):
        fixed = 2 * d_model_p * d_inner_p * cdt_size + small
        # x tile (2x), out tile (2x), h intermediate (f32), y/LN temporaries (f32).
        per_row = d_model_p * (2 * cdt_size + 2 * out_size + 8) + 4 * d_inner_p
        tm = fit_tm(budget - fixed, per_row)
        if tm >= 8 or mode == "resident":
            tm = max(tm, 8)
            return {"mode": "resident", "tm": tm, "tk": d_inner_p,
                    "need": fixed + tm * per_row}

    # --- stream the hidden axis (tk must divide d_inner_p; both are multiples of 128) ---
    tk_cands = [c for c in (d_inner_p, 4096, 2048, 1024, 512, 256, 128)
                if c <= d_inner_p and d_inner_p % c == 0]
    best = None
    for tk in tk_cands:
        fixed = 4 * d_model_p * tk * cdt_size + small             # double-buffered W1/W2 chunks
        # x tile (2x), out tile (2x), acc scratch (f32), LN temps (f32), h chunk (f32).
        per_row = d_model_p * (2 * cdt_size + 2 * out_size + 12) + 4 * tk
        tm = fit_tm(budget - fixed, per_row)
        if tm >= 8:
            cand = {"mode": "stream", "tm": tm, "tk": tk, "need": fixed + tm * per_row}
            if best is None or (cand["tm"], cand["tk"]) > (best["tm"], best["tk"]):
                best = cand
    if best is None:                                              # pathological fallback
        tk = 128 if d_inner_p % 128 == 0 else d_inner_p
        fixed = 4 * d_model_p * tk * cdt_size + small
        per_row = d_model_p * (2 * cdt_size + 2 * out_size + 12) + 4 * tk
        best = {"mode": "stream", "tm": 8, "tk": tk, "need": fixed + 8 * per_row}
    return best


# ----------------------------------------------------------------------------------------------
# Parameter preparation (done ONCE, outside the hot path)
# ----------------------------------------------------------------------------------------------

class PreparedFFNParams(NamedTuple):
    w1: jax.Array          # (d_model_p, d_inner_p), compute dtype, zero-padded
    w2: jax.Array          # (d_inner_p, d_model_p), compute dtype, zero-padded
    b1: jax.Array          # (1, d_inner_p), f32, zero-padded
    consts: jax.Array      # (3, d_model_p), f32: [b2; gamma; beta], zero-padded
    d_model: int
    d_inner: int


def prepare_ffn_params(params, compute_dtype=jnp.bfloat16):
    w1 = jnp.asarray(params["w1"])
    w2 = jnp.asarray(params["w2"])
    b1 = jnp.asarray(params["b1"])
    b2 = jnp.asarray(params["b2"])
    gamma = jnp.asarray(params["ln_gamma"])
    beta = jnp.asarray(params["ln_beta"])

    d_model, d_inner = w1.shape
    assert w2.shape == (d_inner, d_model)
    d_model_p = _round_up(d_model, 128)
    d_inner_p = _round_up(d_inner, 128)

    w1_p = jnp.zeros((d_model_p, d_inner_p), compute_dtype)
    w1_p = w1_p.at[:d_model, :d_inner].set(w1.astype(compute_dtype))
    w2_p = jnp.zeros((d_inner_p, d_model_p), compute_dtype)
    w2_p = w2_p.at[:d_inner, :d_model].set(w2.astype(compute_dtype))
    b1_p = jnp.zeros((1, d_inner_p), jnp.float32).at[0, :d_inner].set(b1.astype(jnp.float32))
    consts = jnp.zeros((3, d_model_p), jnp.float32)
    consts = consts.at[0, :d_model].set(b2.astype(jnp.float32))
    consts = consts.at[1, :d_model].set(gamma.astype(jnp.float32))
    consts = consts.at[2, :d_model].set(beta.astype(jnp.float32))
    return PreparedFFNParams(w1_p, w2_p, b1_p, consts, int(d_model), int(d_inner))


# ----------------------------------------------------------------------------------------------
# Wrapper
# ----------------------------------------------------------------------------------------------

def positionwise_feed_forward(x, prepared: PreparedFFNParams, *, tm_max=1024, eps=1e-6,
                              mode="auto", out_dtype=None, vmem_cap_bytes=None):
    """x: (..., d_model). Returns LayerNorm(x + W2 @ relu(W1 @ x + b1) + b2)."""
    d_model = prepared.d_model
    d_inner = prepared.d_inner
    w1_p, w2_p, b1_p, consts = prepared.w1, prepared.w2, prepared.b1, prepared.consts
    d_model_p, d_inner_p = w1_p.shape
    assert x.shape[-1] == d_model

    cdt = w1_p.dtype
    cdt_size = jnp.dtype(cdt).itemsize
    out_dtype = x.dtype if out_dtype is None else out_dtype
    out_size = jnp.dtype(out_dtype).itemsize

    rows = int(math.prod(x.shape[:-1]))
    vmem_cap = _vmem_capacity_bytes() if vmem_cap_bytes is None else int(vmem_cap_bytes)
    plan = _choose_tiles(rows, d_model_p, d_inner_p, cdt_size, out_size, vmem_cap, tm_max, mode)
    tm, tk = plan["tm"], plan["tk"]
    rows_p = _round_up(rows, tm)

    # Activation padding: skipped entirely when already aligned.
    x2d = x.reshape(rows, d_model).astype(cdt)
    if rows_p != rows or d_model_p != d_model:
        x2d = jnp.pad(x2d, ((0, rows_p - rows), (0, d_model_p - d_model)))

    inv_d = 1.0 / float(d_model)
    n_row_tiles = rows_p // tm

    # Cost estimate: streamed weights are re-read once per row tile.
    weight_bytes = 2 * d_model_p * d_inner_p * cdt_size
    if plan["mode"] == "stream":
        weight_bytes *= n_row_tiles
    cost = pl.CostEstimate(
        flops=int(4 * rows_p * d_model_p * d_inner_p + 10 * rows_p * d_model_p),
        transcendentals=int(rows_p),
        bytes_accessed=int(rows_p * d_model_p * (cdt_size + out_size)
                           + weight_bytes + 4 * (b1_p.size + consts.size)),
    )

    need = plan["need"]
    vmem_limit = int(max(32 * 1024 * 1024, need * 3 // 2 + (4 << 20)))
    vmem_limit = int(min(vmem_limit, vmem_cap * 7 // 8))
    vmem_limit = max(vmem_limit, 16 * 1024 * 1024)

    if plan["mode"] == "resident":
        grid = (n_row_tiles,)
        kernel = functools.partial(_ffn_ln_resident_kernel, inv_d=inv_d, eps=eps)
        in_specs = [
            pl.BlockSpec((tm, d_model_p), lambda i: (i, 0)),          # x tile
            pl.BlockSpec((d_model_p, d_inner_p), lambda i: (0, 0)),   # W1 (resident, one DMA)
            pl.BlockSpec((1, d_inner_p), lambda i: (0, 0)),           # b1 (resident)
            pl.BlockSpec((d_inner_p, d_model_p), lambda i: (0, 0)),   # W2 (resident, one DMA)
            pl.BlockSpec((3, d_model_p), lambda i: (0, 0)),           # b2/gamma/beta (resident)
        ]
        out_specs = pl.BlockSpec((tm, d_model_p), lambda i: (i, 0))
        scratch_shapes = []
        dims = ("parallel",)
    else:
        grid = (n_row_tiles, d_inner_p // tk)
        kernel = functools.partial(_ffn_ln_stream_kernel, tk=tk, inv_d=inv_d, eps=eps)
        in_specs = [
            pl.BlockSpec((tm, d_model_p), lambda i, k: (i, 0)),       # x tile (resident over k)
            pl.BlockSpec((d_model_p, tk), lambda i, k: (0, k)),       # W1 hidden chunk
            pl.BlockSpec((1, d_inner_p), lambda i, k: (0, 0)),        # b1 (resident, sliced in-kernel)
            pl.BlockSpec((tk, d_model_p), lambda i, k: (k, 0)),       # W2 hidden chunk
            pl.BlockSpec((3, d_model_p), lambda i, k: (0, 0)),        # b2/gamma/beta (resident)
        ]
        out_specs = pl.BlockSpec((tm, d_model_p), lambda i, k: (i, 0))
        scratch_shapes = [pltpu.VMEM((tm, d_model_p), jnp.float32)]
        dims = ("parallel", "arbitrary")

    out = pl.pallas_call(
        kernel,
        out_shape=jax.ShapeDtypeStruct((rows_p, d_model_p), out_dtype),
        grid_spec=pltpu.PrefetchScalarGridSpec(
            num_scalar_prefetch=0,
            grid=grid,
            in_specs=in_specs,
            out_specs=out_specs,
            scratch_shapes=scratch_shapes,
        ),
        compiler_params=pltpu.CompilerParams(
            dimension_semantics=dims,
            vmem_limit_bytes=vmem_limit,
        ),
        cost_estimate=cost,
    )(x2d, w1_p, b1_p, w2_p, consts)

    if rows_p != rows or d_model_p != d_model:
        out = out[:rows, :d_model]
    return out.reshape(x.shape[:-1] + (d_model,))


def encoder_layer_forward(enc_input, prepared: PreparedFFNParams, att_type="NoAttention",
                          slf_attn_mask=None, ffn_mode="auto"):
    """Pallas implementation of EncoderLayer.forward (NoAttention path)."""
    if att_type == "NoAttention":
        enc_output = enc_input
        enc_slf_attn = None
    else:
        # TODO(synk): ScaledDotProductAttention / ExternalAttention sub-modules were not provided.
        raise NotImplementedError(att_type)

    enc_output = positionwise_feed_forward(enc_output, prepared, mode=ffn_mode)
    return enc_output, enc_slf_attn


# ----------------------------------------------------------------------------------------------
# Reference + demo
# ----------------------------------------------------------------------------------------------

def _reference_forward(x, p):
    """Pure-JAX reference for a correctness check."""
    h = jnp.maximum(x @ p["w1"] + p["b1"], 0.0)
    y = h @ p["w2"] + p["b2"] + x
    mean = jnp.mean(y, axis=-1, keepdims=True)
    var = jnp.mean((y - mean) ** 2, axis=-1, keepdims=True)
    yh = (y - mean) / jnp.sqrt(var + 1e-6)
    return yh * p["ln_gamma"] + p["ln_beta"]


def init_params(key, d_model, d_inner):
    k1, k2, k3, k4 = jax.random.split(key, 4)
    scale1 = 1.0 / jnp.sqrt(d_model)
    scale2 = 1.0 / jnp.sqrt(d_inner)
    return {
        # Stored pre-transposed relative to torch nn.Linear.weight:
        #   torch: y = x @ W.T + b ; here w1 = W1.T (d_model, d_inner), etc.
        "w1": jax.random.uniform(k1, (d_model, d_inner), jnp.float32, -scale1, scale1),
        "b1": jax.random.uniform(k2, (d_inner,), jnp.float32, -scale1, scale1),
        "w2": jax.random.uniform(k3, (d_inner, d_model), jnp.float32, -scale2, scale2),
        "b2": jax.random.uniform(k4, (d_model,), jnp.float32, -scale2, scale2),
        "ln_gamma": jnp.ones((d_model,), jnp.float32),
        "ln_beta": jnp.zeros((d_model,), jnp.float32),
    }


if __name__ == "__main__":
    # Small shapes consistent with EncoderLayer(d_model, d_inner, n_head, d_k, d_v, 'NoAttention')
    B, N = 2, 8             # batch, sequence length
    d_model, d_inner = 32, 64

    key = jax.random.PRNGKey(0)
    k_x, k_p = jax.random.split(key)
    enc_input = jax.random.normal(k_x, (B, N, d_model), jnp.float32)
    params = init_params(k_p, d_model, d_inner)
    ref = _reference_forward(enc_input, params)

    # 1) f32 compute, auto plan (weight-resident path) -- tight tolerance.
    prep_f32 = prepare_ffn_params(params, compute_dtype=jnp.float32)
    fwd_f32 = jax.jit(lambda x: encoder_layer_forward(x, prep_f32, att_type="NoAttention"))
    out_f32, attn = fwd_f32(enc_input)
    out_f32 = jax.block_until_ready(out_f32)
    assert attn is None
    assert out_f32.shape == (B, N, d_model)
    assert jnp.allclose(out_f32, ref, atol=1e-4, rtol=1e-4), "f32 resident path mismatch"

    # 2) f32 compute, forced hidden-axis streaming path -- exercises the second kernel.
    fwd_stream = jax.jit(lambda x: encoder_layer_forward(x, prep_f32, att_type="NoAttention",
                                                         ffn_mode="stream"))
    out_stream, _ = fwd_stream(enc_input)
    out_stream = jax.block_until_ready(out_stream)
    assert jnp.allclose(out_stream, ref, atol=1e-4, rtol=1e-4), "f32 streaming path mismatch"

    # 3) bf16 MXU path (f32 accumulation + f32 LayerNorm) -- bf16 storage-rounding tolerance.
    prep_bf16 = prepare_ffn_params(params, compute_dtype=jnp.bfloat16)
    fwd_bf16 = jax.jit(lambda x: encoder_layer_forward(x, prep_bf16, att_type="NoAttention"))
    out_bf16, _ = fwd_bf16(enc_input)
    out_bf16 = jax.block_until_ready(out_bf16)
    assert jnp.allclose(out_bf16, ref, atol=3e-2, rtol=3e-2), "bf16 path mismatch"

    print("KERNEL_OK")
</pallas_src>

<mosaic_0001>
module attributes {stable_mosaic.version = 11 : i64} {
  func.func @_ffn_ln_resident_kernel(%arg0: i32, %arg1: memref<8x128xf32, #tpu.memory_space<vmem>>, %arg2: memref<128x128xf32, #tpu.memory_space<vmem>>, %arg3: memref<1x128xf32, #tpu.memory_space<vmem>>, %arg4: memref<128x128xf32, #tpu.memory_space<vmem>>, %arg5: memref<3x128xf32, #tpu.memory_space<vmem>>, %arg6: memref<8x128xf32, #tpu.memory_space<vmem>>) attributes {dimension_semantics = [#tpu.dimension_semantics<parallel>], iteration_bounds = array<i64: 2>, scalar_prefetch = 0 : i64, scratch_operands = 0 : i64, tpu.core_type = #tpu.core_type<tc>, window_params = [{transform_indices = @transform_0, window_bounds = array<i64: 8, 128>}, {pipeline_mode = #tpu.pipeline_mode<synchronous>, transform_indices = @transform_1, window_bounds = array<i64: 128, 128>}, {pipeline_mode = #tpu.pipeline_mode<synchronous>, transform_indices = @transform_2, window_bounds = array<i64: 1, 128>}, {pipeline_mode = #tpu.pipeline_mode<synchronous>, transform_indices = @transform_3, window_bounds = array<i64: 128, 128>}, {pipeline_mode = #tpu.pipeline_mode<synchronous>, transform_indices = @transform_4, window_bounds = array<i64: 3, 128>}, {transform_indices = @transform_5, window_bounds = array<i64: 8, 128>}]} {
    %c0 = arith.constant 0 : index
    %c0_0 = arith.constant 0 : index
    %0 = vector.load %arg1[%c0, %c0_0] : memref<8x128xf32, #tpu.memory_space<vmem>>, vector<8x128xf32>
    %c0_1 = arith.constant 0 : index
    %c0_2 = arith.constant 0 : index
    %1 = vector.load %arg2[%c0_1, %c0_2] : memref<128x128xf32, #tpu.memory_space<vmem>>, vector<128x128xf32>
    %cst = arith.constant dense<0.000000e+00> : vector<8x128xf32>
    %2 = tpu.matmul %0, %1, %cst {dimension_numbers = #tpu.dot_dimension_numbers<[1], [0], [0], [1], [0, 0, 1, 1], [], []>} : vector<8x128xf32>, vector<128x128xf32>, vector<8x128xf32> -> vector<8x128xf32>
    %c0_3 = arith.constant 0 : index
    %c0_4 = arith.constant 0 : index
    %3 = vector.load %arg3[%c0_3, %c0_4] : memref<1x128xf32, #tpu.memory_space<vmem>>, vector<1x128xf32>
    %4 = vector.broadcast %3 : vector<1x128xf32> to vector<8x128xf32>
    %5 = arith.addf %2, %4 : vector<8x128xf32>
    %cst_5 = arith.constant 0.000000e+00 : f32
    %6 = vector.broadcast %cst_5 : f32 to vector<8x128xf32>
    %7 = arith.maximumf %5, %6 : vector<8x128xf32>
    %c0_6 = arith.constant 0 : index
    %c0_7 = arith.constant 0 : index
    %8 = vector.load %arg4[%c0_6, %c0_7] : memref<128x128xf32, #tpu.memory_space<vmem>>, vector<128x128xf32>
    %cst_8 = arith.constant dense<0.000000e+00> : vector<8x128xf32>
    %9 = tpu.matmul %7, %8, %cst_8 {dimension_numbers = #tpu.dot_dimension_numbers<[1], [0], [0], [1], [0, 0, 1, 1], [], []>} : vector<8x128xf32>, vector<128x128xf32>, vector<8x128xf32> -> vector<8x128xf32>
    %10 = arith.addf %9, %0 : vector<8x128xf32>
    %c0_9 = arith.constant 0 : index
    %c0_10 = arith.constant 0 : index
    %11 = vector.load %arg5[%c0_9, %c0_10] : memref<3x128xf32, #tpu.memory_space<vmem>>, vector<1x128xf32>
    %c1 = arith.constant 1 : index
    %c0_11 = arith.constant 0 : index
    %12 = vector.load %arg5[%c1, %c0_11] : memref<3x128xf32, #tpu.memory_space<vmem>>, vector<1x128xf32>
    %c2 = arith.constant 2 : index
    %c0_12 = arith.constant 0 : index
    %13 = vector.load %arg5[%c2, %c0_12] : memref<3x128xf32, #tpu.memory_space<vmem>>, vector<1x128xf32>
    %14 = vector.broadcast %11 : vector<1x128xf32> to vector<8x128xf32>
    %15 = arith.addf %10, %14 : vector<8x128xf32>
    %cst_13 = arith.constant dense<0.000000e+00> : vector<8xf32>
    %16 = vector.multi_reduction <add>, %15, %cst_13 [1] : vector<8x128xf32> to vector<8xf32>
    %17 = vector.shape_cast %16 : vector<8xf32> to vector<8x1xf32>
    %18 = arith.mulf %15, %15 : vector<8x128xf32>
    %cst_14 = arith.constant dense<0.000000e+00> : vector<8xf32>
    %19 = vector.multi_reduction <add>, %18, %cst_14 [1] : vector<8x128xf32> to vector<8xf32>
    %20 = vector.shape_cast %19 : vector<8xf32> to vector<8x1xf32>
    %cst_15 = arith.constant 3.125000e-02 : f32
    %21 = vector.broadcast %cst_15 : f32 to vector<8x1xf32>
    %22 = arith.mulf %17, %21 : vector<8x1xf32>
    %cst_16 = arith.constant 3.125000e-02 : f32
    %23 = vector.broadcast %cst_16 : f32 to vector<8x1xf32>
    %24 = arith.mulf %20, %23 : vector<8x1xf32>
    %25 = arith.mulf %22, %22 : vector<8x1xf32>
    %26 = arith.subf %24, %25 : vector<8x1xf32>
    %27 = vector.broadcast %22 : vector<8x1xf32> to vector<8x128xf32>
    %28 = arith.subf %15, %27 : vector<8x128xf32>
    %cst_17 = arith.constant 9.99999997E-7 : f32
    %29 = vector.broadcast %cst_17 : f32 to vector<8x1xf32>
    %30 = arith.addf %26, %29 : vector<8x1xf32>
    %31 = math.rsqrt %30 : vector<8x1xf32>
    %32 = vector.broadcast %31 : vector<8x1xf32> to vector<8x128xf32>
    %33 = arith.mulf %28, %32 : vector<8x128xf32>
    %34 = vector.broadcast %12 : vector<1x128xf32> to vector<8x128xf32>
    %35 = arith.mulf %33, %34 : vector<8x128xf32>
    %36 = vector.broadcast %13 : vector<1x128xf32> to vector<8x128xf32>
    %37 = arith.addf %35, %36 : vector<8x128xf32>
    %c0_18 = arith.constant 0 : index
    %c0_19 = arith.constant 0 : index
    %38 = vector.load %arg6[%c0_18, %c0_19] : memref<8x128xf32, #tpu.memory_space<vmem>>, vector<8x128xf32>
    tpu.vector_store %arg6[%c0_18, %c0_19], %37 {strides = array<i32>} : memref<8x128xf32, #tpu.memory_space<vmem>>, vector<8x128xf32>,
    return
  }
  func.func @transform_0(%arg0: i32) -> (i32, i32) {
    %c0_i32 = arith.constant 0 : i32
    %c0_i32_0 = arith.constant 0 : i32
    return %arg0, %c0_i32 : i32, i32
  }
  func.func @transform_1(%arg0: i32) -> (i32, i32) {
    %c0_i32 = arith.constant 0 : i32
    %c0_i32_0 = arith.constant 0 : i32
    %c0_i32_1 = arith.constant 0 : i32
    return %c0_i32, %c0_i32_0 : i32, i32
  }
  func.func @transform_2(%arg0: i32) -> (i32, i32) {
    %c0_i32 = arith.constant 0 : i32
    %c0_i32_0 = arith.constant 0 : i32
    %c0_i32_1 = arith.constant 0 : i32
    return %c0_i32, %c0_i32_0 : i32, i32
  }
  func.func @transform_3(%arg0: i32) -> (i32, i32) {
    %c0_i32 = arith.constant 0 : i32
    %c0_i32_0 = arith.constant 0 : i32
    %c0_i32_1 = arith.constant 0 : i32
    return %c0_i32, %c0_i32_0 : i32, i32
  }
  func.func @transform_4(%arg0: i32) -> (i32, i32) {
    %c0_i32 = arith.constant 0 : i32
    %c0_i32_0 = arith.constant 0 : i32
    %c0_i32_1 = arith.constant 0 : i32
    return %c0_i32, %c0_i32_0 : i32, i32
  }
  func.func @transform_5(%arg0: i32) -> (i32, i32) {
    %c0_i32 = arith.constant 0 : i32
    %c0_i32_0 = arith.constant 0 : i32
    return %arg0, %c0_i32 : i32, i32
  }
}

</mosaic_0001>

<bundles_post_ra>
// kernel: _lambda_.1
= control target key start
LH: loop header
LB: loop body
LE: loop exit
PB: predicated region body
PF: predicated region fallthrough
CT: control target
= control target key end

     0   :  { %10 = vsyncpa [#allocation3], 0  ;;  %s664_s0 = inlined_call_operand.vmem [shape: f32[16,128], index: 0, kind: input, shape index: {}]   ;;  %s665_s1 = inlined_call_operand.hbm [shape: f32[128,128], index: 1, kind: input, shape index: {}]   ;;  %s666_s2 = inlined_call_operand.vmem [shape: f32[1,128], index: 2, kind: input, shape index: {}]   ;;  %s667_s3 = inlined_call_operand.hbm [shape: f32[128,128], index: 3, kind: input, shape index: {}]   ;;  %s668_s4 = inlined_call_operand.vmem [shape: f32[3,128], index: 4, kind: input, shape index: {}]   ;;  %s669_s5 = inlined_call_operand.vmem [shape: f32[16,128], index: 5, kind: output, shape index: {}]  }
   0x1   :  { %11 = vsyncpa [#allocation5], 0  ;;  %s599_s18 = smov 0  }
   0x2 LB: > { %s169_s21 = sshll.u32 %s665_s1, 4  ;;  %s608_s22 = sadd.s32 4294967295, %s563_s18   ;;  %s563_s18 = sphi %s599_s18, %s17_s18   ;;  %s170_s21 = int_to_ptr.hbm [resolvable:$true] %s169_s21 }
   0x3   : > { %p441_p0 = scmp.ge.s32.totalorder %s563_s18, 1  ;;  %p158_p1 = scmp.lt.s32.totalorder %s563_s18, 3 }
   0x4   : > { %p467_p2 = scmp.eq.s32.totalorder %s608_s22, 0  ;;  %s565_s24 = smov [#allocation2]  }
   0x5   : > { %p613_p3 = pnand %p441_p0, %p158_p1  ;;  %s171_s25 = sshll.u32 %s565_s24, 4  ;;  %s172_s25 = int_to_ptr.vmem [resolvable:$true] %s171_s25 }
   0x6   : > { %s186_s28 = sshll.u32 %s667_s3, 4  ;;  %s566_s29 = smov [#allocation4]   ;;  %s187_s28 = int_to_ptr.hbm [resolvable:$true] %s186_s28 }
   0x7   : > { %p460_p4 = pneg %p613_p3  ;;  %s188_s30 = sshll.u32 %s566_s29, 4  ;;  %s189_s30 = int_to_ptr.vmem [resolvable:$true] %s188_s30 }
   0x8   : > { %s567_s6 = smov 128   ;;  %s568_s7 = smov 8  }
   0x9   : > { %p461_p5 = pnand %p467_p2, %p460_p4  ;;  %214 = sbr.rel (%p613_p3) target bundleno = 464 (0x1d0), region = 40 }
   0xb   : > { %463 = dma.hbm_to_vmem [thread:$0]  (!%p461_p5), %s170_s21, 2048, %s172_s25, [#allocation3], %s567_s6, %s567_s6, %s568_s7  }
   0xc   : > { %466 = dma.hbm_to_vmem [thread:$0]  (!%p461_p5), %s187_s28, 2048, %s189_s30, [#allocation5], %s567_s6, %s567_s6, %s568_s7  }
   0xe   : > { %554 = dma.done.wait (%p467_p2), [#allocation3], 2048  }
   0xf   : > { %556 = vsyncadd (%p467_p2), [#allocation3], 4294965248 }
  0x10   : > { %558 = dma.done.wait (%p467_p2), [#allocation5], 2048  }
  0x11   : > { %560 = vsyncadd (%p467_p2), [#allocation5], 4294965248  ;;  %v270_v0 = vld [vmem:[#allocation2 + $0x78] sm:$0xff]  ;;  %v269_v1 = vld [vmem:[#allocation2 + $0x70] sm:$0xff]  ;;  %p246_p6 = scmp.lt.s32.totalorder %s608_s22, 1 }
  0x12   : > { %275 = vmatpush.msra.mxu0 %v270_v0  ;;  %v268_v2 = vld [vmem:[#allocation2 + $0x68] sm:$0xff]  ;;  %v267_v3 = vld [vmem:[#allocation2 + $0x60] sm:$0xff]  ;;  %v311_v4 = vld [vmem:[#allocation4 + $0x78] sm:$0xff] }
  0x13   : > { %v266_v5 = vld [vmem:[#allocation2 + $0x58] sm:$0xff]  ;;  %312 = vmatpush.msra.mxu1 %v311_v4  ;;  %v310_v6 = vld [vmem:[#allocation4 + $0x70] sm:$0xff]  ;;  %v309_v7 = vld [vmem:[#allocation4 + $0x68] sm:$0xff]  ;;  %s672_s22 = smov (!%p246_p6, %s608_s22), 1 }
  0x14   : > { %276 = vmatpush.msra.mxu0 %v269_v1  ;;  %v265_v8 = vld [vmem:[#allocation2 + $0x50] sm:$0xff]  ;;  %v308_v9 = vld [vmem:[#allocation4 + $0x60] sm:$0xff]  ;;  %v264_v10 = vld [vmem:[#allocation2 + $0x48] sm:$0xff]  ;;  %s448_s8 = sshll.u32 %s672_s22, 3 }
  0x15   : > { %313 = vmatpush.msra.mxu1 %v310_v6  ;;  %v307_v11 = vld [vmem:[#allocation4 + $0x58] sm:$0xff]  ;;  %v263_v12 = vld [vmem:[#allocation2 + $0x40] sm:$0xff]  ;;  %v306_v13 = vld [vmem:[#allocation4 + $0x50] sm:$0xff]  ;;  %s249_s11 = scalar_lea.vmem %s664_s0, %s448_s8  ;;  %s253_s24 = scalar_lea.vmem %s669_s5, %s448_s8 }
  0x16   : > { %277 = vmatpush.msra.mxu0 %v268_v2  ;;  %v262_v14 = vld [vmem:[#allocation2 + $0x38] sm:$0xff]  ;;  %v305_v15 = vld [vmem:[#allocation4 + $0x48] sm:$0xff]  ;;  %v261_v16 = vld [vmem:[#allocation2 + $0x30] sm:$0xff] }
  0x17   : > { %314 = vmatpush.msra.mxu1 %v309_v7  ;;  %v304_v17 = vld [vmem:[#allocation4 + $0x40] sm:$0xff]  ;;  %v260_v18 = vld [vmem:[#allocation2 + $0x28] sm:$0xff]  ;;  %v303_v19 = vld [vmem:[#allocation4 + $0x38] sm:$0xff] }
  0x18   : > { %278 = vmatpush.msra.mxu0 %v267_v3  ;;  %v259_v20 = vld [vmem:[#allocation2 + $0x20] sm:$0xff]  ;;  %v302_v21 = vld [vmem:[#allocation4 + $0x30] sm:$0xff]  ;;  %v258_v22 = vld [vmem:[#allocation2 + $0x18] sm:$0xff] }
  0x19   : > { %315 = vmatpush.msra.mxu1 %v308_v9  ;;  %v301_v23 = vld [vmem:[#allocation4 + $0x28] sm:$0xff]  ;;  %v257_v24 = vld [vmem:[#allocation2 + $0x10] sm:$0xff]  ;;  %v300_v25 = vld [vmem:[#allocation4 + $0x20] sm:$0xff] }
  0x1a   : > { %279 = vmatpush.msra.mxu0 %v266_v5  ;;  %v256_v26 = vld [vmem:[#allocation2 + $0x8] sm:$0xff]  ;;  %v299_v27 = vld [vmem:[#allocation4 + $0x18] sm:$0xff]  ;;  %v255_v28 = vld [vmem:[#allocation2] sm:$0xff] }
  0x1b   : > { %316 = vmatpush.msra.mxu1 %v307_v11  ;;  %v254_v29 = vld [vmem:[%s249_s11] sm:$0xff]  ;;  %v298_v30 = vld [vmem:[#allocation4 + $0x10] sm:$0xff]  ;;  %v297_v31 = vld [vmem:[#allocation4 + $0x8] sm:$0xff] }
  0x1c   : > { %280 = vmatpush.msra.mxu0 %v265_v8  ;;  %v296_v32 = vld [vmem:[#allocation4] sm:$0xff] }
  0x1d   : > { %317 = vmatpush.msra.mxu1 %v306_v13  ;;  %v483_v33 = vld [vmem:[%s666_s2] ss:$0 sm:$0xff]  ;;  %v485_v56 = vld [vmem:[%s668_s4 + $0x1] ss:$0 sm:$0xff]  ;;  %v486_v58 = vld [vmem:[%s668_s4 + $0x2] ss:$0 sm:$0xff] }
  0x1e   : > { %281 = vmatpush.msra.mxu0 %v264_v10  ;;  %v484_v37 = vld [vmem:[%s668_s4] ss:$0 sm:$0xff] }
  0x1f   : > { %318 = vmatpush.msra.mxu1 %v305_v15 }
  0x20   : > { %282 = vmatpush.msra.mxu0 %v263_v12 }
  0x21   : > { %319 = vmatpush.msra.mxu1 %v304_v17 }
  0x22   : > { %283 = vmatpush.msra.mxu0 %v262_v14 }
  0x23   : > { %320 = vmatpush.msra.mxu1 %v303_v19 }
  0x24   : > { %284 = vmatpush.msra.mxu0 %v261_v16 }
  0x25   : > { %321 = vmatpush.msra.mxu1 %v302_v21 }
  0x26   : > { %285 = vmatpush.msra.mxu0 %v260_v18 }
  0x27   : > { %322 = vmatpush.msra.mxu1 %v301_v23 }
  0x28   : > { %286 = vmatpush.msra.mxu0 %v259_v20 }
  0x29   : > { %323 = vmatpush.msra.mxu1 %v300_v25 }
  0x2a   : > { %287 = vmatpush.msra.mxu0 %v258_v22 }
  0x2b   : > { %324 = vmatpush.msra.mxu1 %v299_v27 }
  0x2c   : > { %288 = vmatpush.msra.mxu0 %v257_v24 }
  0x2d   : > { %325 = vmatpush.msra.mxu1 %v298_v30 }
  0x2e   : > { %289 = vmatpush.msra.mxu0 %v256_v26 }
  0x2f   : > { %326 = vmatpush.msra.mxu1 %v297_v31 }
  0x30   : > { %290 = vmatpush.msra.mxu0 %v255_v28 }
  0x31   : > { %291 = vmatmul.f32.vlgmr.msra.gmra.mxu0 %v254_v29  ;;  %327 = vmatpush.msra.mxu1 %v296_v32 }
  0xae   : > { %v292_v34 = vpop.f32.mrf.mxu0 }
  0xaf   : > { %v293_v35 = vadd.f32 %v483_v33, %v292_v34 }
  0xb1   : > { %v295_v36 = vmax.f32 %v293_v35, 0.0 }
  0xb3   : > { %328 = vmatmul.f32.vlgmr.msra.gmra.mxu1 %v295_v36 }
 0x130   : > { %v329_v38 = vpop.f32.mrf.mxu1 }
 0x131   : > { %v330_v39 = vadd.f32 %v329_v38, %v254_v29 }
 0x133   : > { %v336_v40 = vadd.f32 %v484_v37, %v330_v39 }
 0x135   : > { %337 = vadd.xlane.f32.xlu0 %v336_v40  ;;  %v339_v41 = vmul.f32 %v336_v40, %v336_v40 }
 0x13d   : > { %340 = vadd.xlane.f32.xlu0 %v339_v41 }
 0x1a8   : > { %v338_v42 = vpop.xlane.xlu0 %337 }
 0x1a9   : > { %v342_v43 = vmul.f32 0.03125, %v338_v42 }
 0x1ab   : > { %v344_v45 = vmul.f32 %v342_v43, %v342_v43  ;;  %v346_v55 = vsub.f32 %v336_v40, %v342_v43 }
 0x1b0   : > { %v341_v44 = vpop.xlane.xlu0 %340 }
 0x1b1   : > { %v343_v46 = vmul.f32 0.03125, %v341_v44 }
 0x1b3   : > { %v345_v47 = vsub.f32 %v343_v46, %v344_v45 }
 0x1b5   : > { %v347_v48 = vadd.f32 1e-06, %v345_v47 }
 0x1b7   : > { %487 = vrsqrt.f32 %v347_v48  ;;  %vm354_vm1 = vweird.f32 %v347_v48 }
 0x1bd   : > { %v488_v49 = vpop.eup %487 }
 0x1be   : > { %v349_v50 = vmul.f32 %v488_v49, %v347_v48  ;;  %vm355_vm0 = vweird.f32 %v488_v49 }
 0x1bf   : > { %vm356_vm2 = vmor %vm354_vm1, %vm355_vm0 }
 0x1c0   : > { %v350_v51 = vmul.f32 %v488_v49, %v349_v50 }
 0x1c2   : > { %v351_v52 = vmul.f32 0.5, %v350_v51 }
 0x1c4   : > { %v352_v53 = vsub.f32 1.5, %v351_v52 }
 0x1c6   : > { %v353_v54 = vmul.f32 %v488_v49, %v352_v53 }
 0x1c8   : > { %v357_v57 = vsel %vm356_vm2, %v488_v49, %v353_v54 }
 0x1c9   : > { %v358_v59 = vmul.f32 %v357_v57, %v346_v55 }
 0x1cb   : > { %v360_v60 = vmul.f32 %v485_v56, %v358_v59 }
 0x1cd   : > { %v362_v61 = vadd.f32 %v486_v58, %v360_v60 }
 0x1cf   : > { %363 = vst [vmem:[%s253_s24] sm:$0xff] %v362_v61 }
 0x1d0 PF: > { %s17_s18 = sadd.s32 1, %s563_s18  }
 0x1d1   : > { %p14_p7 = scmp.ge.s32.totalorder %s17_s18, 4  }
 0x1d3   :  { %16 = sbr.rel (!%p14_p7) target bundleno = 2 (0x2), region = 79 }
 0x1d8   :  { %383 = vsyncpa [#allocation3], 1 }
 0x1d9   :  { %385 = vsyncpa [#allocation3 + $0x1], 1 }
 0x1da   :  { %386 = vsyncpa [#allocation5], 1 }

</bundles_post_ra>
